<compile_context>
chip_gen: v6e
topology: v6e:2x2x1
jax: 0.10.0
libtpu: 0.0.40
codegen_flags: <defaults>
</compile_context>

<pallas_src>
import jax
import jax.numpy as jnp
from jax import lax
from jax.experimental import pallas as pl
from jax.experimental.pallas import tpu as pltpu

NUM_BINS = 128    # lane-friendly bin count (one full vreg lane row)
_ROW_TILE = 8     # rows per histogram grid step (full sublane occupancy)
_SUB_COLS = 32    # columns folded into each MXU one-hot reduce (K = 8 * 32 = 256)


# ---------------------------------------------------------------------------
# Pass 1: fused identity copy + global min/max reduction (single HBM read of x).
# ---------------------------------------------------------------------------
def _copy_minmax_kernel(x_ref, y_ref, stats_ref):
    i = pl.program_id(0)
    x = x_ref[...]
    y_ref[...] = x                                    # identity pass-through
    xf = x.astype(jnp.float32)
    tile_min = jnp.min(xf, axis=0, keepdims=True)     # (1, N) per-lane partial
    tile_max = jnp.max(xf, axis=0, keepdims=True)

    @pl.when(i == 0)
    def _():
        stats_ref[0:1, :] = tile_min
        stats_ref[1:2, :] = tile_max

    @pl.when(i != 0)
    def _():
        stats_ref[0:1, :] = jnp.minimum(stats_ref[0:1, :], tile_min)
        stats_ref[1:2, :] = jnp.maximum(stats_ref[1:2, :], tile_max)


def _pick_row_tile(c, row_bytes, max_bytes=1 << 18, min_steps=2):
    """Largest multiple-of-8 divisor of c with tile <= max_bytes, keeping >=2 grid steps."""
    if c % 8 != 0:
        return c                      # ragged leading dim: one full-extent block
    t = 8
    while t * 2 <= c and c % (t * 2) == 0 and (t * 2) * row_bytes <= max_bytes:
        t *= 2
    while t > 8 and c // t < min_steps:
        t //= 2                       # keep the copy software-pipelined (>=2 steps)
    return t


def identity_minmax_pallas(x2d):
    """One pass over x: returns (copy of x, stats) with stats[0]/[1] = per-lane min/max."""
    C, N = x2d.shape
    tile_r = _pick_row_tile(C, N * x2d.dtype.itemsize)
    return pl.pallas_call(
        _copy_minmax_kernel,
        out_shape=(jax.ShapeDtypeStruct((C, N), x2d.dtype),
                   jax.ShapeDtypeStruct((2, N), jnp.float32)),
        grid=(C // tile_r,),
        in_specs=[pl.BlockSpec((tile_r, N), lambda i: (i, 0))],
        out_specs=(pl.BlockSpec((tile_r, N), lambda i: (i, 0)),
                   pl.BlockSpec((2, N), lambda i: (0, 0))),
        compiler_params=pltpu.CompilerParams(
            dimension_semantics=("arbitrary",)),   # stats accumulates across steps
    )(x2d)


# ---------------------------------------------------------------------------
# Pass 2: per-row histogram (second HBM read of x), MXU one-hot reduction.
# ---------------------------------------------------------------------------
def _hist_kernel(params_ref, x_ref, h_ref):
    # params_ref: SMEM f32[2] = (lo, inv_bin_width)
    # x_ref:      VMEM (ROWS, COLS) float     (ROWS rows x one column block)
    # h_ref:      VMEM (ROWS, NUM_BINS) int32 -- resident accumulator over grid axis 1
    rows, cols = x_ref.shape

    @pl.when(pl.program_id(1) == 0)
    def _():
        h_ref[...] = jnp.zeros_like(h_ref)

    lo = params_ref[0]
    inv_w = params_ref[1]
    bins = lax.broadcasted_iota(jnp.int32, (1, 1, NUM_BINS), 2)

    # Row-selector matrices (trace-time constants): sel_w[r, k] = 1 iff k // w == r.
    # They route each flattened chunk element to its owning row in the MXU reduce.
    sel_cache = {}

    def _sel(w):
        if w not in sel_cache:
            r_ids = lax.broadcasted_iota(jnp.int32, (rows, rows * w), 0)
            owner = lax.broadcasted_iota(jnp.int32, (rows, rows * w), 1) // w
            sel_cache[w] = (r_ids == owner).astype(jnp.bfloat16)
        return sel_cache[w]

    # 128-wide lane-aligned groups are sliced from the ref; finer _SUB_COLS-wide chunks
    # are sliced from the in-register value, keeping each one-hot at
    # (rows*_SUB_COLS, NUM_BINS) bf16 (~16 vregs) -- no large materialized one-hot.
    group = 128 if cols % 128 == 0 else cols
    acc = jnp.zeros((rows, NUM_BINS), jnp.float32)
    for g0 in range(0, cols, group):
        xg = x_ref[:, g0:g0 + group].astype(jnp.float32)          # (rows, group)
        t = (xg - lo) * inv_w
        t = jnp.where(t == t, t, 0.0)                             # NaN -> bin 0 (defined)
        idx = jnp.clip(t.astype(jnp.int32), 0, NUM_BINS - 1)      # trunc == floor (t >= 0)
        for s0 in range(0, group, _SUB_COLS):
            w = min(_SUB_COLS, group - s0)
            ids = idx[:, s0:s0 + w]                               # (rows, w) value slice
            onehot = (ids[:, :, None] == bins).astype(jnp.bfloat16)   # (rows, w, B)
            onehot = onehot.reshape(rows * w, NUM_BINS)           # merge leading dims (w % 8 == 0)
            # MXU reduce: exact 0/1 bf16 matmul, f32 accumulate (counts < 2**24).
            acc = acc + jnp.dot(_sel(w), onehot, preferred_element_type=jnp.float32)
    h_ref[...] += acc.astype(jnp.int32)


def _pick_col_block(n):
    for cb in (512, 256, 128):
        if n % cb == 0:
            return cb
    return n   # ragged column count: single column block per row tile


def histogram_pallas(x2d, params):
    """Per-row histogram: x (C, N) -> (C, NUM_BINS) int32 counts, binned over [lo, hi]."""
    C, N = x2d.shape
    # TODO(synk): row lengths that are not a multiple of 8 (fully ragged tails) are not
    # handled by the chunked MXU reduction; the real mlogger backend bins any size.
    assert N % 8 == 0, "flattened row length must be a multiple of 8"

    pad_r = (-C) % _ROW_TILE
    if pad_r:   # pad rows to a multiple of 8; padded rows' counts are discarded below
        x2d = jnp.concatenate([x2d, jnp.zeros((pad_r, N), x2d.dtype)], axis=0)
    Cp = C + pad_r
    col_block = _pick_col_block(N)

    counts = pl.pallas_call(
        _hist_kernel,
        out_shape=jax.ShapeDtypeStruct((Cp, NUM_BINS), jnp.int32),
        grid=(Cp // _ROW_TILE, N // col_block),
        in_specs=[
            pl.BlockSpec(memory_space=pltpu.MemorySpace.SMEM),          # (lo, inv_w)
            pl.BlockSpec((_ROW_TILE, col_block), lambda i, j: (i, j)),
        ],
        out_specs=pl.BlockSpec((_ROW_TILE, NUM_BINS), lambda i, j: (i, 0)),
        compiler_params=pltpu.CompilerParams(
            dimension_semantics=("parallel", "arbitrary")),  # rows shard across TCs
    )(params, x2d)
    return counts[:C]


# ---------------------------------------------------------------------------
class Histogram:
    """JAX/Pallas analog of the mlogger Histogram module (identity forward + histogram)."""

    def __init__(self):
        self._val = None            # raw captured data (like self._val = val)
        self._channel_hists = None  # per-row binned counts (on-device logger analog)
        # TODO(synk): mlogger channel creation / network logging side effects have no
        # Pallas equivalent; the logger-side binning is modelled as on-device histograms.

    def __call__(self, x):
        if x is None:
            return None
        x2d = x if x.ndim == 2 else (x[None, :] if x.ndim == 1 else x.reshape(x.shape[0], -1))
        # Pass 1 (one HBM read of x): identity copy fused with the global min/max.
        y2d, stats = identity_minmax_pallas(x2d)
        lo = jnp.min(stats[0])
        hi = jnp.max(stats[1])
        inv_w = jnp.where(hi > lo, NUM_BINS / (hi - lo), jnp.float32(0.0))
        params = jnp.stack([lo, inv_w]).astype(jnp.float32)
        # Pass 2 (second HBM read of x): per-channel histogram update.
        self._channel_hists = histogram_pallas(x2d, params)
        self._val = x
        return y2d.reshape(x.shape)

    @property
    def value(self):
        return self._val


# ---------------------------------------------------------------------------
if __name__ == "__main__":
    key = jax.random.PRNGKey(0)
    C, N = 32, 256
    x = jax.random.normal(key, (C, N), dtype=jnp.float32)

    hist_mod = Histogram()
    y = hist_mod(x)
    y = jax.block_until_ready(y)
    counts = jax.block_until_ready(hist_mod._channel_hists)

    # forward must be an exact identity
    assert y.shape == x.shape and y.dtype == x.dtype
    assert bool(jnp.all(y == x))

    # every element lands in exactly one bin
    assert counts.shape == (C, NUM_BINS)
    assert bool(jnp.all(jnp.sum(counts, axis=-1) == N))

    # match a pure-jnp reference histogram exactly
    lo = jnp.min(x)
    hi = jnp.max(x)
    inv_w = jnp.where(hi > lo, NUM_BINS / (hi - lo), jnp.float32(0.0))
    ref_idx = jnp.clip(((x - lo) * inv_w).astype(jnp.int32), 0, NUM_BINS - 1)
    ref = jnp.sum(ref_idx[:, :, None] == jnp.arange(NUM_BINS)[None, None, :],
                  axis=1).astype(jnp.int32)
    assert bool(jnp.all(counts == ref))

    print("KERNEL_OK")
</pallas_src>

<mosaic_0001>
module attributes {stable_mosaic.version = 11 : i64} {
  func.func @_copy_minmax_kernel(%arg0: i32, %arg1: memref<16x256xf32, #tpu.memory_space<vmem>>, %arg2: memref<16x256xf32, #tpu.memory_space<vmem>>, %arg3: memref<2x256xf32, #tpu.memory_space<vmem>>) attributes {dimension_semantics = [#tpu.dimension_semantics<arbitrary>], iteration_bounds = array<i64: 2>, scalar_prefetch = 0 : i64, scratch_operands = 0 : i64, tpu.core_type = #tpu.core_type<tc>, window_params = [{transform_indices = @transform_0, window_bounds = array<i64: 16, 256>}, {transform_indices = @transform_1, window_bounds = array<i64: 16, 256>}, {pipeline_mode = #tpu.pipeline_mode<synchronous>, transform_indices = @transform_2, window_bounds = array<i64: 2, 256>}]} {
    %c0 = arith.constant 0 : index
    %c0_0 = arith.constant 0 : index
    %0 = vector.load %arg1[%c0, %c0_0] : memref<16x256xf32, #tpu.memory_space<vmem>>, vector<16x256xf32>
    %c0_1 = arith.constant 0 : index
    %c0_2 = arith.constant 0 : index
    %1 = vector.load %arg2[%c0_1, %c0_2] : memref<16x256xf32, #tpu.memory_space<vmem>>, vector<16x256xf32>
    tpu.vector_store %arg2[%c0_1, %c0_2], %0 {strides = array<i32>} : memref<16x256xf32, #tpu.memory_space<vmem>>, vector<16x256xf32>,
    %cst = arith.constant dense<0x7F800000> : vector<256xf32>
    %2 = vector.multi_reduction <minimumf>, %0, %cst [0] : vector<16x256xf32> to vector<256xf32>
    %3 = vector.shape_cast %2 : vector<256xf32> to vector<1x256xf32>
    %cst_3 = arith.constant dense<0xFF800000> : vector<256xf32>
    %4 = vector.multi_reduction <maximumf>, %0, %cst_3 [0] : vector<16x256xf32> to vector<256xf32>
    %5 = vector.shape_cast %4 : vector<256xf32> to vector<1x256xf32>
    %c0_i32 = arith.constant 0 : i32
    %6 = arith.cmpi eq, %arg0, %c0_i32 : i32
    %7 = arith.extui %6 : i1 to i32
    %c0_i32_4 = arith.constant 0 : i32
    %8 = arith.cmpi ne, %7, %c0_i32_4 : i32
    scf.if %8 {
      %c0_7 = arith.constant 0 : index
      %c0_8 = arith.constant 0 : index
      %12 = vector.load %arg3[%c0_7, %c0_8] : memref<2x256xf32, #tpu.memory_space<vmem>>, vector<1x256xf32>
      tpu.vector_store %arg3[%c0_7, %c0_8], %3 {strides = array<i32>} : memref<2x256xf32, #tpu.memory_space<vmem>>, vector<1x256xf32>,
      %c1 = arith.constant 1 : index
      %c0_9 = arith.constant 0 : index
      %13 = vector.load %arg3[%c1, %c0_9] : memref<2x256xf32, #tpu.memory_space<vmem>>, vector<1x256xf32>
      tpu.vector_store %arg3[%c1, %c0_9], %5 {strides = array<i32>} : memref<2x256xf32, #tpu.memory_space<vmem>>, vector<1x256xf32>,
    } else {
    }
    %c0_i32_5 = arith.constant 0 : i32
    %9 = arith.cmpi ne, %arg0, %c0_i32_5 : i32
    %10 = arith.extui %9 : i1 to i32
    %c0_i32_6 = arith.constant 0 : i32
    %11 = arith.cmpi ne, %10, %c0_i32_6 : i32
    scf.if %11 {
      %c0_7 = arith.constant 0 : index
      %c0_8 = arith.constant 0 : index
      %12 = vector.load %arg3[%c0_7, %c0_8] : memref<2x256xf32, #tpu.memory_space<vmem>>, vector<1x256xf32>
      %13 = arith.minimumf %12, %3 : vector<1x256xf32>
      %c0_9 = arith.constant 0 : index
      %c0_10 = arith.constant 0 : index
      %14 = vector.load %arg3[%c0_9, %c0_10] : memref<2x256xf32, #tpu.memory_space<vmem>>, vector<1x256xf32>
      tpu.vector_store %arg3[%c0_9, %c0_10], %13 {strides = array<i32>} : memref<2x256xf32, #tpu.memory_space<vmem>>, vector<1x256xf32>,
      %c1 = arith.constant 1 : index
      %c0_11 = arith.constant 0 : index
      %15 = vector.load %arg3[%c1, %c0_11] : memref<2x256xf32, #tpu.memory_space<vmem>>, vector<1x256xf32>
      %16 = arith.maximumf %15, %5 : vector<1x256xf32>
      %c1_12 = arith.constant 1 : index
      %c0_13 = arith.constant 0 : index
      %17 = vector.load %arg3[%c1_12, %c0_13] : memref<2x256xf32, #tpu.memory_space<vmem>>, vector<1x256xf32>
      tpu.vector_store %arg3[%c1_12, %c0_13], %16 {strides = array<i32>} : memref<2x256xf32, #tpu.memory_space<vmem>>, vector<1x256xf32>,
    } else {
    }
    return
  }
  func.func @transform_0(%arg0: i32) -> (i32, i32) {
    %c0_i32 = arith.constant 0 : i32
    %c0_i32_0 = arith.constant 0 : i32
    return %arg0, %c0_i32 : i32, i32
  }
  func.func @transform_1(%arg0: i32) -> (i32, i32) {
    %c0_i32 = arith.constant 0 : i32
    %c0_i32_0 = arith.constant 0 : i32
    return %arg0, %c0_i32 : i32, i32
  }
  func.func @transform_2(%arg0: i32) -> (i32, i32) {
    %c0_i32 = arith.constant 0 : i32
    %c0_i32_0 = arith.constant 0 : i32
    %c0_i32_1 = arith.constant 0 : i32
    return %c0_i32, %c0_i32_0 : i32, i32
  }
}

</mosaic_0001>

<bundles_post_ra>
// kernel: tpu_custom_call.1
= control target key start
LH: loop header
LB: loop body
LE: loop exit
PB: predicated region body
PF: predicated region fallthrough
CT: control target
= control target key end

     0   :  { %8 = vsyncpa [#allocation3], 0  ;;  %s816_s0 = inlined_call_operand.hbm [shape: f32[32,256], index: 0, kind: input, shape index: {}]   ;;  %s817_s1 = inlined_call_operand.hbm [shape: f32[32,256], index: 1, kind: output, shape index: {0}]   ;;  %s818_s2 = inlined_call_operand.hbm [shape: f32[2,256], index: 2, kind: output, shape index: {1}]  }
   0x1   :  { %10 = vsyncpa [#allocation3 + $0x1], 0 }
   0x2   :  { %11 = vsyncpa [#allocation4], 0 }
   0x3   :  { %13 = vsyncpa [#allocation4 + $0x1], 0 }
   0x4   :  { %14 = vsyncpa [#allocation7], 0  ;;  %s637_s9 = smov 0   ;;  %s639_s10 = smov 0  }
   0x5   :  { %s641_s11 = smov 0   ;;  %s643_s12 = smov 0  }
   0x6 LB: > { %s658_s13 = sadd.s32 4294967295, %s611_s12   ;;  %s408_s14 = sadd.s32 4294967294, %s611_s12   ;;  %s611_s12 = sphi %s643_s12, %s840_s12   ;;  %s607_s11 = sphi %s641_s11, %s839_s11   ;;  %s603_s10 = sphi %s639_s10, %s838_s10   ;;  %s599_s9 = sphi %s637_s9, %s837_s9  }
   0x7   : > { %s662_s15 = sadd.s32 1, %s611_s12   ;;  %s27_s16 = sadd.s32 1, %s607_s11 }
   0x8   : > { %s24_s17 = ssub.s32 %s611_s12, %s662_s15  ;;  %p34_p0 = scmp.ne.s32.totalorder %s607_s11, %s603_s10 }
   0x9   : > { %p25_p1 = scmp.eq.s32.totalorder %s24_s17, 0  ;;  %p35_p2 = scmp.eq.s32.totalorder %s611_s12, 0 }
   0xa   : > { %p40_p3 = scmp.ne.s32.totalorder %s603_s10, %s599_s9  ;;  %p820_p4 = scmp.eq.s32.totalorder %s658_s13, 0 }
   0xb   : > { %s674_s18 = scalar_select %p25_p1, %s607_s11, %s27_s16  }
   0xc   : > { %p676_p5 = por %p35_p2, %p34_p0  ;;  %p682_p6 = por %p820_p4, %p40_p3 }
   0xd   : > { %p819_p7 = scmp.eq.s32.totalorder %s658_s13, 1  ;;  %p70_p8 = scmp.eq.s32.totalorder %s408_s14, 1 }
   0xe   : > { %s824_s20 = scalar_select %p682_p6, 1, 0 }
   0xf   : > { %p448_p10 = scmp.lt.s32.totalorder %s611_s12, 2  ;;  %p691_p11 = por %p819_p7, %p34_p0 }
  0x10   : > { %p695_p12 = por %p70_p8, %p40_p3  ;;  %s111_s23 = sand.u32 1, %s607_s11  }
  0x11   : > { %s825_s21 = scalar_select %p691_p11, 1, 0 }
  0x12   : > { %s826_s22 = scalar_select %p695_p12, 1, 0 }
  0x13   : > { %s429_s24 = sshll.u32 %s611_s12, 9  ;;  %s411_s25 = sshll.u32 %s111_s23, 5 }
  0x14   : > { %s704_s28 = scalar_lea.hbm %s816_s0, %s429_s24  ;;  %s115_s29 = scalar_lea.vmem [#allocation2], %s411_s25 }
  0x15   : > { %s123_s30 = sshll.u32 %s115_s29, 4  ;;  %p708_p13 = pnand %p448_p10, %p676_p5  ;;  %s712_s30 = int_to_ptr.vmem [resolvable:$true] %s123_s30 }
  0x16   : > { %s714_s4 = scalar_lea.sflag [#allocation3], %s111_s23  ;;  %s491_s5 = scalar_lea.hbm %s704_s28, 512 }
  0x17   : > { %p492_p0 = scmp.ne.s32.totalorder %s704_s28, %s491_s5  ;;  %p493_p1 = pneg %p708_p13 }
  0x18   : > { %s496_s8 = scalar_lea.hbm %s816_s0, 1024  ;;  %p497_p5 = scmp.lt.s32.totalorder %s704_s28, %s816_s0 }
  0x19   : > { %p494_p2 = pnand %p493_p1, %p492_p0  ;;  %p498_p8 = scmp.lt.s32.totalorder %s496_s8, %s491_s5 }
  0x1b   : > { %p495_p3 = pneg %p494_p2  ;;  %p499_p10 = por %p498_p8, %p497_p5 }
  0x1d   : > { %p500_p9 = pnand %p499_p10, %p495_p3 }
  0x1f   : > { %503 = shalt.err (!%p500_p9)
}
  0x20   : > { %s504_s17 = scalar_lea.vmem %s712_s30, 512  ;;  %s613_s19 = smov [#allocation2]  }
  0x21   : > { %p505_p7 = scmp.ne.s32.totalorder %s712_s30, %s504_s17  ;;  %s509_s23 = sshll.u32 %s613_s19, 4  ;;  %s510_s23 = int_to_ptr.vmem [resolvable:$false] %s509_s23 }
  0x22   : > { %s511_s24 = scalar_lea.vmem %s510_s23, 1024  ;;  %p512_p2 = scmp.lt.s32.totalorder %s712_s30, %s510_s23 }
  0x23   : > { %p507_p4 = pnand %p505_p7, %p493_p1  ;;  %p513_p12 = scmp.lt.s32.totalorder %s511_s24, %s504_s17 }
  0x25   : > { %p508_p0 = pneg %p507_p4  ;;  %p514_p11 = por %p513_p12, %p512_p2 }
  0x27   : > { %p515_p6 = pnand %p514_p11, %p508_p0 }
  0x29   : > { %518 = shalt.err (!%p515_p6)
}
  0x2a   : > { %s614_s25 = smov 256   ;;  %s615_s26 = smov 16  }
  0x2b   : > { %443 = dma.hbm_to_vmem [thread:$0]  (!%p708_p13), %s704_s28, 512, %s712_s30, %s714_s4, %s614_s25, %s614_s25, %s615_s26  }
  0x2c   : > { %p415_p4 = scmp.ge.s32.totalorder %s611_s12, 1  ;;  %p131_p7 = scmp.lt.s32.totalorder %s611_s12, 3 }
  0x2e   : > { %p132_p9 = pnand %p415_p4, %p131_p7 }
  0x2f   : > { %s738_s27 = sand.u32 (!%p132_p9), 1, %s603_s10   ;;  %p828_p6 = scmp.ne.s32.totalorder (!%p132_p9), %s824_s20, 0 }
  0x30   : > { %135 = sbr.rel (%p132_p9) target bundleno = 146 (0x92), region = 24  ;;  %s416_s29 = sshll.u32 (!%p132_p9), %s738_s27, 5 }
  0x31   : > { %s138_s5 = scalar_lea.sflag (!%p132_p9), [#allocation3], %s738_s27  ;;  %s141_s6 = scalar_lea.vmem (!%p132_p9), [#allocation2], %s416_s29 }
  0x35   : > { %586 = dma.done.wait (%p828_p6), %s138_s5, 512  }
  0x36   : > { %588 = vsyncadd (%p828_p6), %s138_s5, 4294966784  ;;  %v164_v0 = vld [vmem:[%s141_s6] sm:$0xff]  ;;  %v165_v1 = vld [vmem:[%s141_s6 + $0x8] sm:$0xff]  ;;  %s746_s28 = scalar_lea.vmem [#allocation5], %s416_s29  ;;  %p418_p11 = scmp.ne.s32.totalorder %s658_s13, 0 }
  0x37   : > { %v166_v2 = vld [vmem:[%s141_s6 + $0x10] sm:$0xff]  ;;  %168 = vst [vmem:[%s746_s28] sm:$0xff] %v164_v0  ;;  %169 = vst [vmem:[%s746_s28 + $0x8] sm:$0xff] %v165_v1  ;;  %v167_v5 = vld [vmem:[%s141_s6 + $0x18] sm:$0xff] }
  0x38   : > { %170 = vst [vmem:[%s746_s28 + $0x10] sm:$0xff] %v166_v2  ;;  %v172_v3 = vmin.f32 %v164_v0, %v166_v2  ;;  %v186_v4 = vmax.f32 %v164_v0, %v166_v2  ;;  %171 = vst [vmem:[%s746_s28 + $0x18] sm:$0xff] %v167_v5  ;;  %v179_v6 = vmin.f32 %v165_v1, %v167_v5 }
  0x39   : > { %v193_v7 = vmax.f32 %v165_v1, %v167_v5 }
  0x3a   : > { %v173_v8 = vrot.slane %v172_v3, 4  ;;  %v187_v9 = vrot.slane %v186_v4, 4  ;;  %v180_v10 = vrot.slane %v179_v6, 4 }
  0x3b   : > { %v194_v11 = vrot.slane %v193_v7, 4 }
  0x3c   : > { %v174_v12 = vmin.f32 %v172_v3, %v173_v8  ;;  %v188_v13 = vmax.f32 %v186_v4, %v187_v9  ;;  %v181_v14 = vmin.f32 %v179_v6, %v180_v10 }
  0x3d   : > { %v195_v15 = vmax.f32 %v193_v7, %v194_v11 }
  0x3e   : > { %v175_v16 = vrot.slane %v174_v12, 2  ;;  %v189_v17 = vrot.slane %v188_v13, 2  ;;  %v182_v18 = vrot.slane %v181_v14, 2 }
  0x3f   : > { %v196_v19 = vrot.slane %v195_v15, 2 }
  0x40   : > { %v176_v20 = vmin.f32 %v174_v12, %v175_v16  ;;  %v190_v21 = vmax.f32 %v188_v13, %v189_v17  ;;  %v183_v22 = vmin.f32 %v181_v14, %v182_v18 }
  0x41   : > { %v197_v23 = vmax.f32 %v195_v15, %v196_v19  ;;  %203 = sbr.rel (%p418_p11) target bundleno = 82 (0x52), region = 32 }
  0x42   : > { %v177_v24 = vrot.slane %v176_v20, 1  ;;  %v191_v25 = vrot.slane %v190_v21, 1  ;;  %v184_v26 = vrot.slane %v183_v22, 1 }
  0x43   : > { %v198_v27 = vrot.slane %v197_v23, 1 }
  0x44   : > { %v178_v28 = vmin.f32 %v176_v20, %v177_v24  ;;  %v192_v29 = vmax.f32 %v190_v21, %v191_v25  ;;  %v185_v30 = vmin.f32 %v183_v22, %v184_v26 }
  0x45   : > { %v199_v31 = vmax.f32 %v197_v23, %v198_v27 }
  0x46   : > { %v210_v32 = vlaneseq  ;;  %v616_v33 = vmov 1966171168   ;;  %v206_v36 = vcombine.low %v178_v28, %v185_v30 }
  0x47   : > { %v208_v34 = vunpack.c.l.s4 %v616_v33  ;;  %v229_v38 = vcombine.low %v192_v29, %v199_v31 }
  0x48   : > { %v211_v35 = vshrl.u32 %v210_v32, 7  ;;  %vm224_vm0 = vcmp.lt.s32.totalorder %v210_v32, 256 }
  0x49   : > { %v209_v37 = vunpack.c.0.s8 %v208_v34 }
  0x4b   : > { %v212_v39 = vsub.s32 %v209_v37, %v211_v35 }
  0x4d   : > { %v213_v40 = vrot.slane %v206_v36, %v212_v39  ;;  %v236_v41 = vrot.slane %v229_v38, %v212_v39 }
  0x4f   : > { %v220_v42 = vrot.slane %v213_v40, %v212_v39  ;;  %v243_v43 = vrot.slane %v236_v41, %v212_v39 }
  0x51   : > { %226 = vst.msk [vmem:[#allocation6] ss:$2 sm:$0x3] %vm224_vm0, %v220_v42  ;;  %246 = vst.msk [vmem:[#allocation6 + $0x1] ss:$2 sm:$0x3] %vm224_vm0, %v243_v43 }
  0x52 PF: > { %p829_p12 = scmp.eq.s32.totalorder %s658_s13, 0 }
  0x54   : > { %250 = sbr.rel (%p829_p12) target bundleno = 103 (0x67), region = 36 }
  0x59   : > { %v258_v44 = vlaneseq  ;;  %v617_v45 = vmov 1966171168   ;;  %v254_v48 = vcombine.low %v178_v28, %v185_v30  ;;  %v280_v50 = vcombine.low %v192_v29, %v199_v31  ;;  %v251_v54 = vld [vmem:[#allocation6] ss:$2 sm:$0x3] }
  0x5a   : > { %v256_v46 = vunpack.c.l.s4 %v617_v45  ;;  %v277_v55 = vld [vmem:[#allocation6 + $0x1] ss:$2 sm:$0x3] }
  0x5b   : > { %v259_v47 = vshrl.u32 %v258_v44, 7  ;;  %vm273_vm1 = vcmp.lt.s32.totalorder %v258_v44, 256 }
  0x5c   : > { %v257_v49 = vunpack.c.0.s8 %v256_v46 }
  0x5e   : > { %v260_v51 = vsub.s32 %v257_v49, %v259_v47 }
  0x60   : > { %v261_v52 = vrot.slane %v254_v48, %v260_v51  ;;  %v287_v53 = vrot.slane %v280_v50, %v260_v51 }
  0x62   : > { %v268_v56 = vrot.slane %v261_v52, %v260_v51  ;;  %v294_v57 = vrot.slane %v287_v53, %v260_v51 }
  0x64   : > { %v270_v58 = vmin.f32 %v251_v54, %v268_v56  ;;  %v296_v59 = vmax.f32 %v277_v55, %v294_v57 }
  0x66   : > { %275 = vst.msk [vmem:[#allocation6] ss:$2 sm:$0x3] %vm273_vm1, %v270_v58  ;;  %297 = vst.msk [vmem:[#allocation6 + $0x1] ss:$2 sm:$0x3] %vm273_vm1, %v296_v59 }
  0x67 PF: > { %s431_s20 = sshll.u32 %s658_s13, 9  ;;  %s313_s7 = sshll.u32 %s746_s28, 4  ;;  %s762_s7 = int_to_ptr.vmem [resolvable:$true] %s313_s7 }
  0x68   : > { %s759_s4 = scalar_lea.hbm %s817_s1, %s431_s20  ;;  %s299_s8 = scalar_lea.sflag [#allocation4], %s738_s27 }
  0x69   : > { %s519_s14 = scalar_lea.vmem %s762_s7, 512  ;;  %p830_p1 = scmp.ne.s32.totalorder %s825_s21, 0 }
  0x6a   : > { %p520_p13 = scmp.ne.s32.totalorder %s762_s7, %s519_s14  ;;  %s618_s16 = smov [#allocation5]  }
  0x6b   : > { %s523_s17 = sshll.u32 %s618_s16, 4  ;;  %s524_s17 = int_to_ptr.vmem [resolvable:$false] %s523_s17 }
  0x6c   : > { %p521_p3 = pnand %p520_p13, %p830_p1  ;;  %s525_s19 = scalar_lea.vmem %s524_s17, 1024 }
  0x6d   : > { %p526_p8 = scmp.lt.s32.totalorder %s762_s7, %s524_s17  ;;  %p527_p10 = scmp.lt.s32.totalorder %s525_s19, %s519_s14 }
  0x6e   : > { %p522_p5 = pneg %p521_p3 }
  0x6f   : > { %p528_p0 = por %p527_p10, %p526_p8 }
  0x71   : > { %p529_p2 = pnand %p528_p0, %p522_p5 }
  0x73   : > { %532 = shalt.err (!%p529_p2)
}
  0x74   : > { %s533_s23 = scalar_lea.hbm %s759_s4, 512  ;;  %s537_s26 = scalar_lea.hbm %s817_s1, 1024 }
  0x75   : > { %p534_p4 = scmp.ne.s32.totalorder %s759_s4, %s533_s23  ;;  %p538_p6 = scmp.lt.s32.totalorder %s759_s4, %s817_s1 }
  0x76   : > { %p539_p11 = scmp.lt.s32.totalorder %s537_s26, %s533_s23 }
  0x77   : > { %p535_p7 = pnand %p534_p4, %p830_p1 }
  0x78   : > { %p540_p12 = por %p539_p11, %p538_p6 }
  0x79   : > { %p536_p9 = pneg %p535_p7 }
  0x7b   : > { %p541_p13 = pnand %p540_p12, %p536_p9 }
  0x7d   : > { %544 = shalt.err (!%p541_p13)
}
  0x7e   : > { %s619_s6 = smov 256   ;;  %s620_s28 = smov 16  }
  0x7f   : > { %434 = dma.vmem_to_hbm [thread:$0]  (%p830_p1), %s762_s7, 512, %s759_s4, %s299_s8, %s619_s6, %s619_s6, %s620_s28  }
  0x80   : > { %s621_s20 = smov [#allocation6]   ;;  %p831_p5 = scmp.eq.s32.totalorder %s658_s13, 1 }
  0x81   : > { %s327_s30 = sshll.u32 %s621_s20, 4  ;;  %s328_s30 = int_to_ptr.vmem [resolvable:$true] %s327_s30 }
  0x82   : > { %s545_s3 = scalar_lea.vmem %s328_s30, 64  ;;  %p552_p0 = scmp.lt.s32.totalorder %s328_s30, %s328_s30 }
  0x83   : > { %p546_p3 = scmp.ne.s32.totalorder %s328_s30, %s545_s3  ;;  %p553_p2 = scmp.lt.s32.totalorder %s545_s3, %s545_s3 }
  0x85   : > { %p547_p8 = pnand %p546_p3, %p831_p5  ;;  %p554_p4 = por %p553_p2, %p552_p0 }
  0x87   : > { %p548_p10 = pneg %p547_p8 }
  0x89   : > { %p555_p7 = pnand %p554_p4, %p548_p10 }
  0x8b   : > { %558 = shalt.err (!%p555_p7)
}
  0x8c   : > { %p832_p9 = pmov %p831_p5  ;;  %p833_p1 = pmov %p831_p5 }
  0x8e   : > { %436 = dma.vmem_to_hbm [thread:$0]  (%p832_p9), %s328_s30, 64, %s818_s2, [#allocation7]  }
  0x8f   : > { %590 = dma.done.wait (%p833_p1), [#allocation7], 64   ;;  %p834_p6 = pmov %p833_p1 }
  0x91   : > { %592 = vsyncadd (%p834_p6), [#allocation7], 4294967232 }
  0x92 PF: > { %s343_s21 = sand.u32 1, %s599_s9   ;;  %p835_p11 = scmp.ne.s32.totalorder %s826_s22, 0 }
  0x93   : > { %p836_p12 = scmp.ge.s32.totalorder %s611_s12, 2  ;;  %s344_s27 = scalar_lea.sflag [#allocation4], %s343_s21 }
  0x95   : > { %p445_p13 = pnand %p836_p12, %p835_p11 }
  0x97   : > { %p446_p3 = pneg %p445_p13 }
  0x99   : > { %594 = dma.done.wait (%p446_p3), %s344_s27, 512  }
  0x9a   : > { %596 = vsyncadd (%p446_p3), %s344_s27, 4294966784  ;;  %p17_p5 = scmp.ge.s32.totalorder %s662_s15, 4   ;;  %s837_s9 = smov %s603_s10 }
  0x9b   : > { %s838_s10 = smov %s607_s11  ;;  %s839_s11 = smov %s674_s18 }
  0x9c   : > { %s840_s12 = smov %s662_s15  ;;  %19 = sbr.rel (!%p17_p5) target bundleno = 6 (0x6), region = 87 }
  0xa1   :  { %349 = vsyncpa [#allocation3], 1 }
  0xa2   :  { %351 = vsyncpa [#allocation3 + $0x1], 1 }
  0xa3   :  { %352 = vsyncpa [#allocation4], 1 }
  0xa4   :  { %354 = vsyncpa [#allocation4 + $0x1], 1 }
  0xa5   :  { %355 = vsyncpa [#allocation7], 1 }

</bundles_post_ra>
